<compile_context>
chip_gen: v5e
topology: v5e:2x2
jax: 0.10.0
libtpu: 0.0.40
codegen_flags: <defaults>
</compile_context>

<pallas_src>
import jax
import jax.numpy as jnp
from jax.experimental import pallas as pl
from jax.experimental.pallas import tpu as pltpu


def _masked_conv_block_kernel(len_ref, w_ref, x_ref, t_ref, shift_ref, out_ref):
    """Fused conv(matmul) + folded BN affine + Hardtanh(0,20) + time mask.

    Grid is (M-tile j, batch b); j is the OUTER axis so the (1, TM) time-index
    tile and the (Cout, K) weights/shift stay VMEM-resident across b.
      len_ref   : (B,)          int32 SMEM (scalar prefetch)
      w_ref     : (Cout, K)     bf16, BN scale folded in        (resident)
      x_ref     : (1, K, TM)    bf16 im2col patch tile, lanes = flattened (d,t)
      t_ref     : (1, TM)       int32 output-time index of every lane
      shift_ref : (Cout, 1)     f32 folded conv-bias / BN shift (resident)
      out_ref   : (1, Cout, TM) lane-dense NCHW-flat output tile (bf16 or f32)
    """
    b = pl.program_id(1)
    acc = jnp.dot(w_ref[...], x_ref[0],
                  preferred_element_type=jnp.float32)          # (Cout, TM) MXU
    y = jnp.clip(acc + shift_ref[...], 0.0, 20.0)              # BN + bias, Hardtanh
    keep = t_ref[...] < len_ref[b]                              # (1, TM) mask
    out_ref[0] = jnp.where(keep, y, 0.0).astype(out_ref.dtype)


def _im2col_kM(x, KH, KW, SH, SW, PH, PW):
    """(B, Cin, D, T) -> patches (B, K, M): K = Cin*KH*KW sublane-major,
    M = Do*To lane-major (time fastest).  Pure XLA glue (pad/slice/stack) run
    in the caller's dtype (bf16) so the amplified patch array is half-width."""
    B, Cin, D, T = x.shape
    Do = (D + 2 * PH - KH) // SH + 1
    To = (T + 2 * PW - KW) // SW + 1
    xp = jnp.pad(x, ((0, 0), (0, 0), (PH, PH), (PW, PW)))
    cols = []
    for kh in range(KH):
        for kw in range(KW):
            cols.append(xp[:, :, kh:kh + (Do - 1) * SH + 1:SH,
                                 kw:kw + (To - 1) * SW + 1:SW])   # (B,Cin,Do,To)
    patches = jnp.stack(cols, axis=2)                  # (B, Cin, KH*KW, Do, To)
    return patches.reshape(B, Cin * KH * KW, Do * To), Do, To


def _pick_m_tile(M, max_lanes=2048):
    """Lane-tile size and grid extent for the flattened M = Do*To axis.

    Prefers (a) a single full-M tile when M is small, else (b) the largest
    multiple-of-128 divisor of M <= max_lanes (no padded tail), else (c) a
    fixed max_lanes tile with a cdiv grid (Pallas pads the trailing partial
    block and drops out-of-range writes).  No degenerate TM = M fallback."""
    if M <= max_lanes:
        return M, 1
    start = max_lanes - max_lanes % 128
    for tm in range(start, 127, -128):
        if M % tm == 0:
            return tm, M // tm
    return start, pl.cdiv(M, start)


def masked_conv_block(x, lengths, w, bias, gamma, beta, mean, var,
                      stride, padding, eps=1e-5, out_dtype=jnp.float32):
    """One MaskConv block: Conv2d + BatchNorm2d(eval) + Hardtanh(0,20), with
    positions t >= lengths[b] zeroed along the output time axis. NCHW in/out."""
    B = x.shape[0]
    Cout, Cin, KH, KW = w.shape
    SH, SW = stride
    PH, PW = padding

    # bf16 BEFORE im2col: halves the K-amplified patch HBM traffic and removes
    # the old separate f32->bf16 cast pass over the patch array.
    x = x.astype(jnp.bfloat16)
    patches, Do, To = _im2col_kM(x, KH, KW, SH, SW, PH, PW)
    K = Cin * KH * KW
    M = Do * To
    TM, n_m_tiles = _pick_m_tile(M)

    # Fold BN(eval) scale into the weights; conv bias + BN shift into `shift`.
    scale = gamma / jnp.sqrt(var + eps)                         # (Cout,)
    shift = (bias - mean) * scale + beta                        # (Cout,)
    w2 = (w.reshape(Cout, K) * scale[:, None]).astype(jnp.bfloat16)
    shift2 = shift.reshape(Cout, 1).astype(jnp.float32)

    # Output-time index of every flattened (d, t) lane (avoids an in-kernel
    # integer modulo, which the VPU has no hardware divide for).  With j as
    # the OUTER grid axis this tile is fetched once per M-tile, not per (b, j).
    tvec = jnp.broadcast_to(jnp.arange(To, dtype=jnp.int32)[None, :],
                            (Do, To)).reshape(1, M)

    out_bytes = jnp.dtype(out_dtype).itemsize
    flops = 2 * B * M * K * Cout + 5 * B * M * Cout
    bytes_accessed = (patches.size * 2 + w2.size * 2 + shift2.size * 4
                      + M * 4 + B * Cout * M * out_bytes)

    # Tight VMEM budget: double-buffered patch/output/tvec tiles + resident
    # weights/shift, x4 headroom (true per-step working set is ~1 MiB).
    Kp = ((K + 7) // 8) * 8
    tile_bytes = Kp * TM * 2 + Cout * TM * out_bytes + 8 * TM * 4
    resident = Cout * max(K, 128) * 2 + Cout * 128 * 4
    vmem_limit = int(min(max(4 * (2 * tile_bytes + resident), 4 << 20), 32 << 20))

    out = pl.pallas_call(
        _masked_conv_block_kernel,
        out_shape=jax.ShapeDtypeStruct((B, Cout, M), out_dtype),
        grid_spec=pltpu.PrefetchScalarGridSpec(
            num_scalar_prefetch=1,                    # lengths -> SMEM
            grid=(n_m_tiles, B),                      # j outer, b inner
            in_specs=[
                pl.BlockSpec((Cout, K), lambda j, b, lens: (0, 0)),
                pl.BlockSpec((1, K, TM), lambda j, b, lens: (b, 0, j)),
                pl.BlockSpec((1, TM), lambda j, b, lens: (0, j)),
                pl.BlockSpec((Cout, 1), lambda j, b, lens: (0, 0)),
            ],
            out_specs=pl.BlockSpec((1, Cout, TM), lambda j, b, lens: (b, 0, j)),
        ),
        compiler_params=pltpu.CompilerParams(
            dimension_semantics=("parallel", "parallel"),  # 2 TCs on v7x
            vmem_limit_bytes=vmem_limit),
        cost_estimate=pl.CostEstimate(flops=int(flops), transcendentals=0,
                                      bytes_accessed=int(bytes_accessed)),
    )(lengths, w2, patches, tvec, shift2)

    # (B, Cout, M) is already NCHW-flat -> free reshape, no transpose.
    return out.reshape(B, Cout, Do, To)


def mask_conv_forward(x, lengths, blocks):
    """MaskConv.forward: apply the conv stack, masking t >= lengths[i] after
    each module (fused per block; lengths passed through unchanged).
    Intermediate blocks emit bf16 (the next block consumes bf16 anyway); the
    final block emits f32 to preserve the module-boundary dtype."""
    n = len(blocks)
    for i, p in enumerate(blocks):
        out_dtype = jnp.float32 if i == n - 1 else jnp.bfloat16
        x = masked_conv_block(x, lengths, out_dtype=out_dtype, **p)
    return x, lengths


# --------------------- pure-JAX reference (module-by-module, like PyTorch) ---
def _mask_T(x, lengths):
    T = x.shape[-1]
    keep = jnp.arange(T)[None, :] < lengths[:, None]        # (B, T)
    return x * keep[:, None, None, :].astype(x.dtype)


def reference_forward(x, lengths, blocks, eps=1e-5):
    for p in blocks:
        SH, SW = p["stride"]
        PH, PW = p["padding"]
        x = jax.lax.conv_general_dilated(
            x, p["w"], window_strides=(SH, SW),
            padding=((PH, PH), (PW, PW)),
            dimension_numbers=("NCHW", "OIHW", "NCHW"),
            precision=jax.lax.Precision.HIGHEST) + p["bias"][None, :, None, None]
        x = _mask_T(x, lengths)
        scale = p["gamma"] / jnp.sqrt(p["var"] + eps)
        x = (x - p["mean"][None, :, None, None]) * scale[None, :, None, None] \
            + p["beta"][None, :, None, None]
        x = _mask_T(x, lengths)
        x = jnp.clip(x, 0.0, 20.0)
        x = _mask_T(x, lengths)
    return x, lengths


if __name__ == "__main__":
    key = jax.random.PRNGKey(0)
    ks = jax.random.split(key, 4)

    B, Cin, D, T = 2, 1, 16, 1024
    x = jax.random.normal(ks[0], (B, Cin, D, T), jnp.float32)
    # Pre-round activations to bf16-representable values so the bf16 MXU feed
    # is exact on the inputs; the f32 reference then isolates kernel error.
    x = x.astype(jnp.bfloat16).astype(jnp.float32)
    lengths = jnp.array([300, 117], dtype=jnp.int32)   # both get time-masked

    def make_block(kseed, cin, cout, kh, kw, stride, padding):
        k = jax.random.split(kseed, 6)
        return dict(
            w=0.15 * jax.random.normal(k[0], (cout, cin, kh, kw), jnp.float32),
            bias=0.1 * jax.random.normal(k[1], (cout,), jnp.float32),
            gamma=1.0 + 0.1 * jax.random.normal(k[2], (cout,), jnp.float32),
            beta=0.1 * jax.random.normal(k[3], (cout,), jnp.float32),
            mean=0.1 * jax.random.normal(k[4], (cout,), jnp.float32),
            var=1.0 + 0.1 * jnp.abs(jax.random.normal(k[5], (cout,), jnp.float32)),
            stride=stride, padding=padding)

    # DeepSpeech2-style stack, scaled down: two (Conv2d, BN, Hardtanh) blocks.
    # Block 1 has M = 4096 -> two 2048-lane M tiles (exercises the tiled path).
    blocks = [
        make_block(ks[1], cin=1, cout=8, kh=3, kw=3, stride=(2, 2), padding=(1, 1)),
        make_block(ks[2], cin=8, cout=16, kh=3, kw=3, stride=(2, 1), padding=(1, 1)),
    ]

    out, out_lengths = mask_conv_forward(x, lengths, blocks)
    out = jax.block_until_ready(out)

    ref, _ = reference_forward(x, lengths, blocks)
    assert out.shape == ref.shape, (out.shape, ref.shape)
    err = float(jnp.max(jnp.abs(out.astype(jnp.float32) - ref)))
    if err > 5e-2:
        raise AssertionError(f"Pallas MaskConv mismatch: max abs err {err}")

    print("KERNEL_OK")
</pallas_src>

<mosaic_0001>
module attributes {stable_mosaic.version = 11 : i64} {
  func.func @_masked_conv_block_kernel(%arg0: i32, %arg1: i32, %arg2: memref<2xi32, #tpu.memory_space<smem>>, %arg3: memref<8x9xbf16, #tpu.memory_space<vmem>>, %arg4: memref<1x9x2048xbf16, #tpu.memory_space<vmem>>, %arg5: memref<1x2048xi32, #tpu.memory_space<vmem>>, %arg6: memref<8x1xf32, #tpu.memory_space<vmem>>, %arg7: memref<1x8x2048xbf16, #tpu.memory_space<vmem>>) attributes {dimension_semantics = [#tpu.dimension_semantics<parallel>, #tpu.dimension_semantics<parallel>], iteration_bounds = array<i64: 2, 2>, scalar_prefetch = 1 : i64, scratch_operands = 0 : i64, tpu.core_type = #tpu.core_type<tc>, window_params = [{pipeline_mode = #tpu.pipeline_mode<synchronous>, transform_indices = @transform_0, window_bounds = array<i64: 8, 9>}, {transform_indices = @transform_1, window_bounds = array<i64: 1, 9, 2048>}, {transform_indices = @transform_2, window_bounds = array<i64: 1, 2048>}, {pipeline_mode = #tpu.pipeline_mode<synchronous>, transform_indices = @transform_3, window_bounds = array<i64: 8, 1>}, {transform_indices = @transform_4, window_bounds = array<i64: 1, 8, 2048>}]} {
    %c0 = arith.constant 0 : index
    %c0_0 = arith.constant 0 : index
    %0 = vector.load %arg3[%c0, %c0_0] : memref<8x9xbf16, #tpu.memory_space<vmem>>, vector<8x9xbf16>
    %c0_1 = arith.constant 0 : index
    %c0_2 = arith.constant 0 : index
    %c0_3 = arith.constant 0 : index
    %1 = vector.load %arg4[%c0_1, %c0_2, %c0_3] : memref<1x9x2048xbf16, #tpu.memory_space<vmem>>, vector<1x9x2048xbf16>
    %2 = vector.shape_cast %1 : vector<1x9x2048xbf16> to vector<9x2048xbf16>
    %cst = arith.constant dense<0.000000e+00> : vector<8x2048xf32>
    %3 = tpu.matmul %0, %2, %cst {dimension_numbers = #tpu.dot_dimension_numbers<[1], [0], [0], [1], [0, 0, 1, 1], [], []>} : vector<8x9xbf16>, vector<9x2048xbf16>, vector<8x2048xf32> -> vector<8x2048xf32>
    %c0_4 = arith.constant 0 : index
    %c0_5 = arith.constant 0 : index
    %4 = vector.load %arg6[%c0_4, %c0_5] : memref<8x1xf32, #tpu.memory_space<vmem>>, vector<8x1xf32>
    %5 = vector.broadcast %4 : vector<8x1xf32> to vector<8x2048xf32>
    %6 = arith.addf %3, %5 : vector<8x2048xf32>
    %cst_6 = arith.constant 0.000000e+00 : f32
    %cst_7 = arith.constant 2.000000e+01 : f32
    %7 = vector.broadcast %cst_6 : f32 to vector<8x2048xf32>
    %8 = arith.maximumf %7, %6 : vector<8x2048xf32>
    %9 = vector.broadcast %cst_7 : f32 to vector<8x2048xf32>
    %10 = arith.minimumf %9, %8 : vector<8x2048xf32>
    %c0_8 = arith.constant 0 : index
    %c0_9 = arith.constant 0 : index
    %11 = vector.load %arg5[%c0_8, %c0_9] : memref<1x2048xi32, #tpu.memory_space<vmem>>, vector<1x2048xi32>
    %12 = arith.index_cast %arg1 : i32 to index
    %13 = memref.load %arg2[%12] : memref<2xi32, #tpu.memory_space<smem>>
    %14 = vector.broadcast %13 : i32 to vector<1x2048xi32>
    %15 = arith.cmpi slt, %11, %14 : vector<1x2048xi32>
    %cst_10 = arith.constant 0.000000e+00 : f32
    %16 = vector.shape_cast %15 : vector<1x2048xi1> to vector<1x2048xi1>
    %17 = vector.broadcast %16 : vector<1x2048xi1> to vector<8x2048xi1>
    %18 = vector.broadcast %cst_10 : f32 to vector<8x2048xf32>
    %19 = arith.select %17, %10, %18 : vector<8x2048xi1>, vector<8x2048xf32>
    %20 = arith.truncf %19 : vector<8x2048xf32> to vector<8x2048xbf16>
    %c0_11 = arith.constant 0 : index
    %c0_12 = arith.constant 0 : index
    %c0_13 = arith.constant 0 : index
    %21 = vector.load %arg7[%c0_11, %c0_12, %c0_13] : memref<1x8x2048xbf16, #tpu.memory_space<vmem>>, vector<1x8x2048xbf16>
    %22 = vector.shape_cast %21 : vector<1x8x2048xbf16> to vector<8x2048xbf16>
    %23 = vector.shape_cast %20 : vector<8x2048xbf16> to vector<1x8x2048xbf16>
    tpu.vector_store %arg7[%c0_11, %c0_12, %c0_13], %23 {strides = array<i32>} : memref<1x8x2048xbf16, #tpu.memory_space<vmem>>, vector<1x8x2048xbf16>,
    return
  }
  func.func @transform_0(%arg0: i32, %arg1: i32, %arg2: memref<2xi32, #tpu.memory_space<smem>>) -> (i32, i32) {
    %c0_i32 = arith.constant 0 : i32
    %c0_i32_0 = arith.constant 0 : i32
    %c0_i32_1 = arith.constant 0 : i32
    return %c0_i32, %c0_i32_0 : i32, i32
  }
  func.func @transform_1(%arg0: i32, %arg1: i32, %arg2: memref<2xi32, #tpu.memory_space<smem>>) -> (i32, i32, i32) {
    %c0_i32 = arith.constant 0 : i32
    %c0_i32_0 = arith.constant 0 : i32
    return %arg1, %c0_i32, %arg0 : i32, i32, i32
  }
  func.func @transform_2(%arg0: i32, %arg1: i32, %arg2: memref<2xi32, #tpu.memory_space<smem>>) -> (i32, i32) {
    %c0_i32 = arith.constant 0 : i32
    %c0_i32_0 = arith.constant 0 : i32
    return %c0_i32, %arg0 : i32, i32
  }
  func.func @transform_3(%arg0: i32, %arg1: i32, %arg2: memref<2xi32, #tpu.memory_space<smem>>) -> (i32, i32) {
    %c0_i32 = arith.constant 0 : i32
    %c0_i32_0 = arith.constant 0 : i32
    %c0_i32_1 = arith.constant 0 : i32
    return %c0_i32, %c0_i32_0 : i32, i32
  }
  func.func @transform_4(%arg0: i32, %arg1: i32, %arg2: memref<2xi32, #tpu.memory_space<smem>>) -> (i32, i32, i32) {
    %c0_i32 = arith.constant 0 : i32
    %c0_i32_0 = arith.constant 0 : i32
    return %arg1, %c0_i32, %arg0 : i32, i32, i32
  }
}

</mosaic_0001>

<bundles_post_ra>
// kernel: tpu_custom_call.1
= control target key start
LH: loop header
LB: loop body
LE: loop exit
PB: predicated region body
PF: predicated region fallthrough
CT: control target
= control target key end

     0   :  { %s1159_s21 = smov [#allocation3]   ;;  %s1517_s0 = inlined_call_operand.vmem [shape: s32[2], index: 0, kind: input, shape index: {}]   ;;  %s1518_s1 = inlined_call_operand.vmem [shape: bf16[8,9], index: 1, kind: input, shape index: {}]   ;;  %s1519_s2 = inlined_call_operand.vmem [shape: bf16[2,9,4096], index: 2, kind: input, shape index: {}]   ;;  %s1520_s3 = inlined_call_operand.vmem [shape: s32[1,4096], index: 3, kind: input, shape index: {}]   ;;  %s1521_s4 = inlined_call_operand.vmem [shape: f32[8,1], index: 4, kind: input, shape index: {}]   ;;  %s1522_s5 = inlined_call_operand.hbm [shape: bf16[2,8,4096], index: 5, kind: output, shape index: {}]  }
   0x1   :  { %s11_s20 = sshll.u32 %s1517_s0, 4  ;;  %s12_s20 = int_to_ptr.vmem [resolvable:$true] %s11_s20 }
   0x2   :  { %14 = dma.vmem_to_smem %s12_s20, 16, %s1159_s21, [#allocation2] }
   0x3   :  { %1121 = dma.done.wait [#allocation2], 16 }
   0x4   :  { %1122 = vsyncadd [#allocation2], 4294967280 }
   0x5   :  { %17 = sfence }
   0x6   :  { %18 = vsyncpa [#allocation6], 0 }
   0x7   :  { %20 = vsyncpa [#allocation6 + $0x1], 0  ;;  %s1195_s22 = smov 0   ;;  %s1197_s23 = smov 0  }
   0x8   :  { %s1199_s24 = smov 0   ;;  %s1201_s25 = smov 0  }
   0x9   :  { %s1203_s26 = smov 0   ;;  %s1205_s27 = smov 0  }
   0xa   :  { %s1207_s0 = smov 0   ;;  %s1209_s28 = smov 0  }
   0xb LB: > { %s860_s29 = sadd.s32 4294967295, %s1157_s28   ;;  %s861_s30 = sadd.s32 4294967294, %s1157_s28   ;;  %s1157_s28 = sphi %s1209_s28, %s26_s28   ;;  %s1153_s0 = sphi %s1207_s0, %s1534_s0   ;;  %s1149_s27 = sphi %s1205_s27, %s1533_s27   ;;  %s1145_s26 = sphi %s1203_s26, %s1532_s26   ;;  %s1141_s25 = sphi %s1201_s25, %s1531_s25   ;;  %s1137_s24 = sphi %s1199_s24, %s1530_s24   ;;  %s1133_s23 = sphi %s1197_s23, %s1529_s23   ;;  %s1129_s22 = sphi %s1195_s22, %s1528_s22  }
   0xc   : > { %s35_s6 = sadd.s32 1, %s1149_s27  ;;  %s38_s7 = sadd.s32 1, %s1153_s0 }
   0xd   : > { %p36_p0 = scmp.ge.s32.totalorder %s35_s6, 2  ;;  %p75_p1 = scmp.ne.s32.totalorder %s1137_s24, %s1133_s23 }
   0xe   : > { %p76_p2 = scmp.eq.s32.totalorder %s1157_s28, 0  ;;  %p154_p5 = scmp.eq.s32.totalorder %s860_s29, 3 }
   0xf   : > { %s1536_s6 = smov (%p36_p0, %s35_s6), 0  ;;  %s1538_s7 = smov (!%p36_p0, %s38_s7), %s1153_s0 }
  0x10   : > { %s63_s8 = ssub.s32 %s1149_s27, %s1536_s6  ;;  %p1247_p3 = por %p76_p2, %p75_p1 }
  0x11   : > { %p40_p4 = scmp.ge.s32.totalorder %s1538_s7, 2  ;;  %p159_p6 = scmp.ne.s32.totalorder %s1133_s23, %s1129_s22 }
  0x12   : > { %p160_p7 = scmp.eq.s32.totalorder %s861_s30, 3  ;;  %p1255_p8 = por %p154_p5, %p75_p1 }
  0x13   : > { %s1540_s7 = smov (%p40_p4, %s1538_s7), 0  ;;  %s68_s14 = sadd.s32 1, %s1137_s24 }
  0x14   : > { %p1259_p9 = por %p160_p7, %p159_p6  ;;  %s64_s12 = ssub.s32 %s1153_s0, %s1540_s7 }
  0x15   : > { %s65_s13 = sor.u32 %s64_s12, %s63_s8  ;;  %p863_p11 = scmp.ge.s32.totalorder %s1157_s28, 4 }
  0x16   : > { %p66_p10 = scmp.eq.s32.totalorder %s65_s13, 0 }
  0x17   : > { %182 = sbr.rel (%p863_p11) target bundleno = 51 (0x33), region = 24 }
  0x18   : > { %s1267_s15 = scalar_select %p66_p10, %s1137_s24, %s68_s14  }
  0x1c   : > { %185 = sbr.rel (!%p1247_p3) target bundleno = 51 (0x33), region = 28  ;;  %s187_s16 = sand.u32 (%p1247_p3), 1, %s1137_s24  }
  0x1d   : > { %s865_s17 = sshll.u32 (%p1247_p3), %s1153_s0, 4  ;;  %s864_s18 = sshll.u32 (%p1247_p3), %s187_s16, 7 }
  0x1e   : > { %s866_s19 = sshll.u32 (%p1247_p3), %s1149_s27, 6  ;;  %s189_s9 = scalar_lea.vmem (%p1247_p3), [#allocation4], %s864_s18 }
  0x1f   : > { %s192_s20 = sadd.s32 (%p1247_p3), %s866_s19, %s865_s17 }
  0x20   : > { %s867_s21 = sshll.u32 (%p1247_p3), %s192_s20, 2 }
  0x21   : > { %s1278_s8 = scalar_lea.vmem %s1519_s2, %s867_s21 }
  0x22   : > { %v207_v0 = vld [vmem:[%s1278_s8] sm:$0xff]  ;;  %v209_v1 = vld [vmem:[%s1278_s8 + $0x8] sm:$0xff]  ;;  %v211_v2 = vld [vmem:[%s1278_s8 + $0x10] sm:$0xff] }
  0x23   : > { %208 = vst [vmem:[%s189_s9] sm:$0xff] %v207_v0  ;;  %v213_v3 = vld [vmem:[%s1278_s8 + $0x18] sm:$0xff]  ;;  %v215_v4 = vld [vmem:[%s1278_s8 + $0x20] sm:$0xff]  ;;  %v217_v5 = vld [vmem:[%s1278_s8 + $0x28] sm:$0xff] }
  0x24   : > { %210 = vst [vmem:[%s189_s9 + $0x8] sm:$0xff] %v209_v1  ;;  %v219_v6 = vld [vmem:[%s1278_s8 + $0x30] sm:$0xff]  ;;  %v221_v7 = vld [vmem:[%s1278_s8 + $0x38] sm:$0xff]  ;;  %v223_v8 = vld [vmem:[%s1278_s8 + $0x80] sm:$0xff] }
  0x25   : > { %212 = vst [vmem:[%s189_s9 + $0x10] sm:$0xff] %v211_v2  ;;  %v225_v9 = vld [vmem:[%s1278_s8 + $0x88] sm:$0xff]  ;;  %v227_v10 = vld [vmem:[%s1278_s8 + $0x90] sm:$0xff]  ;;  %v229_v11 = vld [vmem:[%s1278_s8 + $0x98] sm:$0xff] }
  0x26   : > { %214 = vst [vmem:[%s189_s9 + $0x18] sm:$0xff] %v213_v3  ;;  %v231_v12 = vld [vmem:[%s1278_s8 + $0xa0] sm:$0xff]  ;;  %v233_v13 = vld [vmem:[%s1278_s8 + $0xa8] sm:$0xff]  ;;  %v235_v14 = vld [vmem:[%s1278_s8 + $0xb0] sm:$0xff] }
  0x27   : > { %216 = vst [vmem:[%s189_s9 + $0x20] sm:$0xff] %v215_v4  ;;  %v237_v15 = vld [vmem:[%s1278_s8 + $0xb8] sm:$0xff] }
  0x28   : > { %218 = vst [vmem:[%s189_s9 + $0x28] sm:$0xff] %v217_v5 }
  0x29   : > { %220 = vst [vmem:[%s189_s9 + $0x30] sm:$0xff] %v219_v6 }
  0x2a   : > { %222 = vst [vmem:[%s189_s9 + $0x38] sm:$0xff] %v221_v7 }
  0x2b   : > { %224 = vst [vmem:[%s189_s9 + $0x40] sm:$0xff] %v223_v8 }
  0x2c   : > { %226 = vst [vmem:[%s189_s9 + $0x48] sm:$0xff] %v225_v9 }
  0x2d   : > { %228 = vst [vmem:[%s189_s9 + $0x50] sm:$0xff] %v227_v10 }
  0x2e   : > { %230 = vst [vmem:[%s189_s9 + $0x58] sm:$0xff] %v229_v11 }
  0x2f   : > { %232 = vst [vmem:[%s189_s9 + $0x60] sm:$0xff] %v231_v12 }
  0x30   : > { %234 = vst [vmem:[%s189_s9 + $0x68] sm:$0xff] %v233_v13 }
  0x31   : > { %236 = vst [vmem:[%s189_s9 + $0x70] sm:$0xff] %v235_v14 }
  0x32   : > { %238 = vst [vmem:[%s189_s9 + $0x78] sm:$0xff] %v237_v15 }
  0x33 PF: > { %p868_p12 = scmp.ge.s32.totalorder %s1157_s28, 1  ;;  %p251_p13 = scmp.lt.s32.totalorder %s1157_s28, 5 }
  0x35   : > { %p252_p0 = pnand %p868_p12, %p251_p13 }
  0x36   : > { %s1299_s12 = sand.u32 (!%p252_p0), 1, %s1133_s23   ;;  %s1396_s20 = sshll.u32 (!%p252_p0), %s1145_s26, 4 }
  0x37   : > { %255 = sbr.rel (%p252_p0) target bundleno = 264 (0x108), region = 55  ;;  %s869_s13 = sshll.u32 (!%p252_p0), %s1299_s12, 7 }
  0x38   : > { %s1308_s17 = scalar_lea.vmem (!%p252_p0), [#allocation4], %s869_s13  ;;  %p289_p1 = scmp.lt.s32.totalorder (!%p252_p0), %s1396_s20, 31 }
  0x39   : > { %s1400_s21 = sld [smem:[#allocation3 + %s1141_s25]] (!%p252_p0)  ;;  %s870_s26 = sshll.u32 (!%p252_p0), %s1299_s12, 6 }
  0x3a   : > { %s1432_s13 = scalar_lea.vmem (!%p252_p0), [#allocation5], %s870_s26  ;;  %s954_s14 = sshll.u32 (!%p252_p0), %s1141_s25, 5 }
  0x3b   : > { %s762_s16 = sadd.s32 (!%p252_p0), %s954_s14, %s1396_s20  ;;  %s1081_s14 = scalar_lea.hbm (!%p252_p0), %s1522_s5, 256 }
  0x3c   : > { %vm386_vm0 = vcmask 1043456   ;;  %vm387_vm1 = vcmask 1044480   ;;  %v1160_v16 = vmov 65535   ;;  %v312_v18 = vld [vmem:[%s1521_s4] sm:$0xff]  ;;  %v1161_v20 = vmov 0   ;;  %s290_s29 = scalar_select %p289_p1, %s1396_s20, 31 }
  0x3d   : > { %v388_v17 = vsel %vm386_vm0, 4294967295, %v1160_v16  ;;  %1048 = vset.pattern.permute.xlu0 %v1161_v20  ;;  %v874_v21 = vld [vmem:[%s1308_s17] sm:$0xf]  ;;  %v958_v23 = vld [vmem:[%s1308_s17 + $0x4] sm:$0xf]  ;;  %vm382_vm2 = vcmask 72704  }
  0x3e   : > { %v1305_v19 = vsel %vm387_vm1, %v388_v17, 0  ;;  %v966_v22 = vld [vmem:[%s1308_s17 + $0x3c] sm:$0x10]  ;;  %315 = vperm.xlu0 %1048, %v312_v18   ;;  %v876_v25 = vld [vmem:[%s1308_s17 + $0x40] sm:$0x10]  ;;  %s1406_s9 = scalar_lea.vmem %s1520_s3, %s290_s29  ;;  %s766_s20 = sshll.u32 %s1432_s13, 4  ;;  %s767_s20 = int_to_ptr.vmem [resolvable:$true] %s766_s20 }
  0x3f   : > { %v875_v24 = vor.u32 %v966_v22, %v874_v21  ;;  %v882_v26 = vld [vmem:[%s1308_s17 + $0x8] sm:$0xf]  ;;  %v879_v28 = vor.u32 %v958_v23, %v876_v25  ;;  %v959_v30 = vld [vmem:[%s1308_s17 + $0xc] sm:$0xf]  ;;  %v898_v32 = vld [vmem:[%s1308_s17 + $0x18] sm:$0xf] }
  0x40   : > { %v967_v27 = vld [vmem:[%s1308_s17 + $0x44] sm:$0x10]  ;;  %v884_v31 = vld [vmem:[%s1308_s17 + $0x48] sm:$0x10]  ;;  %v1323_v35 = vld [vmem:[%s1518_s1] sm:$0xf] }
  0x41   : > { %v883_v29 = vor.u32 %v967_v27, %v882_v26  ;;  %v391_v33 = vand.u32 %v875_v24, %v1305_v19  ;;  %v887_v34 = vor.u32 %v959_v30, %v884_v31  ;;  %v969_v36 = vld [vmem:[%s1308_s17 + $0x54] sm:$0x10]  ;;  %v961_v37 = vld [vmem:[%s1308_s17 + $0x1c] sm:$0xf]  ;;  %v394_v39 = vand.u32 %v879_v28, %v1305_v19  ;;  %v890_v43 = vld [vmem:[%s1308_s17 + $0x10] sm:$0xf] }
  0x42   : > { %v900_v38 = vld [vmem:[%s1308_s17 + $0x58] sm:$0x10]  ;;  %v899_v41 = vor.u32 %v969_v36, %v898_v32  ;;  %v968_v44 = vld [vmem:[%s1308_s17 + $0x4c] sm:$0x10]  ;;  %v960_v45 = vld [vmem:[%s1308_s17 + $0x14] sm:$0xf] }
  0x43   : > { %v397_v40 = vand.u32 %v883_v29, %v1305_v19  ;;  %v903_v42 = vor.u32 %v961_v37, %v900_v38  ;;  %445 = vmatpush.bf16.msra.mxu0 %v391_v33  ;;  %v400_v46 = vand.u32 %v887_v34, %v1305_v19  ;;  %v891_v47 = vor.u32 %v968_v44, %v890_v43  ;;  %v892_v48 = vld [vmem:[%s1308_s17 + $0x50] sm:$0x10]  ;;  %v914_v49 = vld [vmem:[%s1308_s17 + $0x28] sm:$0xf]  ;;  %v963_v53 = vld [vmem:[%s1308_s17 + $0x2c] sm:$0xf] }
  0x44   : > { %458 = vmatpush.bf16.msra.mxu1 %v394_v39  ;;  %v409_v50 = vand.u32 %v899_v41, %v1305_v19  ;;  %v895_v51 = vor.u32 %v960_v45, %v892_v48  ;;  %v971_v52 = vld [vmem:[%s1308_s17 + $0x64] sm:$0x10]  ;;  %v916_v54 = vld [vmem:[%s1308_s17 + $0x68] sm:$0x10]  ;;  %v906_v59 = vld [vmem:[%s1308_s17 + $0x20] sm:$0xf] }
  0x45   : > { %471 = vmatpush.bf16.msra.mxu2 %v397_v40  ;;  %484 = vmatpush.bf16.msra.mxu3 %v400_v46  ;;  %v412_v55 = vand.u32 %v903_v42, %v1305_v19  ;;  %v403_v56 = vand.u32 %v891_v47, %v1305_v19  ;;  %v915_v57 = vor.u32 %v971_v52, %v914_v49  ;;  %v970_v60 = vld [vmem:[%s1308_s17 + $0x5c] sm:$0x10]  ;;  %v962_v63 = vld [vmem:[%s1308_s17 + $0x24] sm:$0xf]  ;;  %v930_v6 = vld [vmem:[%s1308_s17 + $0x38] sm:$0xf] }
  0x46   : > { %v919_v58 = vor.u32 %v963_v53, %v916_v54  ;;  %936 = vmatmul.msk.bf16.vlgmr.msra.gmra.mxu0 %vm382_vm2, %v1323_v35  ;;  %v406_v61 = vand.u32 %v895_v51, %v1305_v19  ;;  %v907_v62 = vor.u32 %v970_v60, %v906_v59  ;;  %v908_v0 = vld [vmem:[%s1308_s17 + $0x60] sm:$0x10]  ;;  %v973_v7 = vld [vmem:[%s1308_s17 + $0x74] sm:$0x10]  ;;  %v965_v8 = vld [vmem:[%s1308_s17 + $0x3c] sm:$0xf] }
  0x47   : > { %937 = vmatmul.msk.bf16.vlgmr.msra.gmra.mxu1 %vm382_vm2, %v1323_v35  ;;  %v421_v1 = vand.u32 %v915_v57, %v1305_v19  ;;  %v911_v3 = vor.u32 %v962_v63, %v908_v0  ;;  %497 = vmatpush.bf16.msrb.mxu0 %v403_v56  ;;  %v932_v9 = vld [vmem:[%s1308_s17 + $0x78] sm:$0x10]  ;;  %v922_v10 = vld [vmem:[%s1308_s17 + $0x30] sm:$0xf]  ;;  %v964_v12 = vld [vmem:[%s1308_s17 + $0x34] sm:$0xf]  ;;  %v931_v14 = vor.u32 %v973_v7, %v930_v6 }
  0x48   : > { %938 = vmatmul.msk.bf16.vlgmr.msra.gmra.mxu2 %vm382_vm2, %v1323_v35  ;;  %v424_v2 = vand.u32 %v919_v58, %v1305_v19  ;;  %939 = vmatmul.msk.bf16.vlgmr.msra.gmra.mxu3 %vm382_vm2, %v1323_v35  ;;  %v415_v4 = vand.u32 %v907_v62, %v1305_v19  ;;  %v972_v11 = vld [vmem:[%s1308_s17 + $0x6c] sm:$0x10]  ;;  %v924_v13 = vld [vmem:[%s1308_s17 + $0x70] sm:$0x10]  ;;  %v935_v15 = vor.u32 %v965_v8, %v932_v9  ;;  %v678_v24 = vld [vmem:[%s1406_s9] sm:$0xff]  ;;  %s955_s17 = sshll.u32 %s762_s16, 2 }
  0x49   : > { %523 = vmatpush.bf16.msrb.mxu2 %v409_v50  ;;  %536 = vmatpush.bf16.msrb.mxu3 %v412_v55  ;;  %v418_v5 = vand.u32 %v911_v3, %v1305_v19  ;;  %v923_v16 = vor.u32 %v972_v11, %v922_v10  ;;  %v927_v17 = vor.u32 %v964_v12, %v924_v13  ;;  %s764_s19 = scalar_lea.hbm %s1522_s5, %s955_s17  ;;  %s751_s29 = scalar_lea.sflag [#allocation6], %s1299_s12 }
  0x4a   : > { %510 = vmatpush.bf16.msrb.mxu1 %v406_v61  ;;  %v433_v18 = vand.u32 %v931_v14, %v1305_v19  ;;  %v436_v21 = vand.u32 %v935_v15, %v1305_v19 }
  0x4b   : > { %549 = vmatpush.bf16.msra.mxu0 %v415_v4  ;;  %v427_v22 = vand.u32 %v923_v16, %v1305_v19  ;;  %v430_v23 = vand.u32 %v927_v17, %v1305_v19  ;;  %v681_v19 = vstv %s1400_s21  ;;  %v679_v4 = vld [vmem:[%s1406_s9 + $0x8] sm:$0xff]  ;;  %s768_s21 = sshll.u32 %s764_s19, 4  ;;  %s769_s21 = int_to_ptr.hbm [resolvable:$true] %s768_s21 }
  0x4c   : > { %vm682_vm3 = vcmp.lt.s32.totalorder %v678_v24, %v681_v19  ;;  %vm683_vm10 = vcmp.lt.s32.totalorder %v679_v4, %v681_v19  ;;  %s1075_s30 = sshra.s32 %s769_s21, 4  ;;  %s1076_s30 = int_to_ptr.hbm [resolvable:$true] %s1075_s30 }
  0x4d   : > { %575 = vmatpush.bf16.msra.mxu2 %v421_v1  ;;  %588 = vmatpush.bf16.msra.mxu3 %v424_v2  ;;  %v1413_v25 = vsel %vm682_vm3, 1, %v1161_v20  ;;  %s1077_s8 = scalar_lea.hbm %s1076_s30, 64  ;;  %p1082_p5 = scmp.lt.s32.totalorder %s1076_s30, %s1522_s5 }
  0x4e   : > { %562 = vmatpush.bf16.msra.mxu1 %v418_v5  ;;  %v686_v27 = vperm.slane %v1413_v25, 0  ;;  %v687_v29 = vperm.slane %v1413_v25, 1  ;;  %v688_v39 = vperm.slane %v1413_v25, 2  ;;  %v689_v43 = vperm.slane %v1413_v25, 3  ;;  %p1078_p2 = scmp.ne.s32.totalorder %s1076_s30, %s1077_s8  ;;  %p1083_p6 = scmp.lt.s32.totalorder %s1081_s14, %s1077_s8 }
  0x4f   : > { %v690_v59 = vperm.slane %v1413_v25, 4  ;;  %v691_v62 = vperm.slane %v1413_v25, 5  ;;  %v692_v7 = vperm.slane %v1413_v25, 6  ;;  %v693_v11 = vperm.slane %v1413_v25, 7 }
  0x50   : > { %vm1421_vm4 = vcmp.eq.s32.totalorder %v686_v27, 1  ;;  %vm703_vm5 = vcmp.eq.s32.totalorder %v687_v29, 1  ;;  %vm704_vm6 = vcmp.eq.s32.totalorder %v688_v39, 1  ;;  %vm705_vm7 = vcmp.eq.s32.totalorder %v689_v43, 1  ;;  %p1079_p3 = pnand %p1078_p2, %p1255_p8  ;;  %p1084_p7 = por %p1083_p6, %p1082_p5 }
  0x51   : > { %vm706_vm8 = vcmp.eq.s32.totalorder %v690_v59, 1  ;;  %vm707_vm9 = vcmp.eq.s32.totalorder %v691_v62, 1  ;;  %vm708_vm11 = vcmp.eq.s32.totalorder %v692_v7, 1  ;;  %vm709_vm12 = vcmp.eq.s32.totalorder %v693_v11, 1 }
  0x52   : > { %p1080_p4 = pneg %p1079_p3 }
  0x54   : > { %p1085_p10 = pnand %p1084_p7, %p1080_p4 }
  0x56   : > { %940 = vmatmul.msk.bf16.vlgmr.msrb.gmra.mxu0 %vm382_vm2, %v1323_v35 }
  0x57   : > { %941 = vmatmul.msk.bf16.vlgmr.msrb.gmra.mxu1 %vm382_vm2, %v1323_v35  ;;  %601 = vmatpush.bf16.msrb.mxu0 %v427_v22 }
  0x58   : > { %942 = vmatmul.msk.bf16.vlgmr.msrb.gmra.mxu2 %vm382_vm2, %v1323_v35  ;;  %943 = vmatmul.msk.bf16.vlgmr.msrb.gmra.mxu3 %vm382_vm2, %v1323_v35 }
  0x59   : > { %627 = vmatpush.bf16.msrb.mxu2 %v433_v18  ;;  %640 = vmatpush.bf16.msrb.mxu3 %v436_v21  ;;  %v1449_v21 = vsel %vm683_vm10, 1, %v1161_v20 }
  0x5a   : > { %614 = vmatpush.bf16.msrb.mxu1 %v430_v23  ;;  %v696_v39 = vperm.slane %v1449_v21, 2  ;;  %v697_v43 = vperm.slane %v1449_v21, 3 }
  0x5c   : > { %vm712_vm15 = vcmp.eq.s32.totalorder %v696_v39, 1  ;;  %vm713_vm0 = vcmp.eq.s32.totalorder %v697_v43, 1 }
  0x66   : > { %944 = vmatmul.msk.bf16.vlgmr.msra.gmra.mxu0 %vm382_vm2, %v1323_v35 }
  0x67   : > { %945 = vmatmul.msk.bf16.vlgmr.msra.gmra.mxu1 %vm382_vm2, %v1323_v35 }
  0x68   : > { %946 = vmatmul.msk.bf16.vlgmr.msra.gmra.mxu2 %vm382_vm2, %v1323_v35  ;;  %947 = vmatmul.msk.bf16.vlgmr.msra.gmra.mxu3 %vm382_vm2, %v1323_v35 }
  0x76   : > { %948 = vmatmul.msk.bf16.vlgmr.msrb.gmra.mxu0 %vm382_vm2, %v1323_v35 }
  0x77   : > { %949 = vmatmul.msk.bf16.vlgmr.msrb.gmra.mxu1 %vm382_vm2, %v1323_v35 }
  0x78   : > { %950 = vmatmul.msk.bf16.vlgmr.msrb.gmra.mxu2 %vm382_vm2, %v1323_v35  ;;  %951 = vmatmul.msk.bf16.vlgmr.msrb.gmra.mxu3 %vm382_vm2, %v1323_v35 }
  0xb0   : > { %v1415_v26 = vpop.permute.xlu0 %315 }
  0xc3   : > { %v447_v28 = vpop.f32.mrf.mxu0 }
  0xc4   : > { %v460_v30 = vpop.f32.mrf.mxu1  ;;  %v448_v31 = vadd.f32 %v447_v28, %v1415_v26 }
  0xc5   : > { %v461_v32 = vadd.f32 %v460_v30, %v1415_v26  ;;  %v694_v30 = vperm.slane %v1449_v21, 0 }
  0xc6   : > { %v646_v33 = vmax.f32 %v448_v31, 0.0 }
  0xc7   : > { %v647_v35 = vmax.f32 %v461_v32, 0.0  ;;  %v695_v32 = vperm.slane %v1449_v21, 1  ;;  %vm710_vm13 = vcmp.eq.s32.totalorder %v694_v30, 1 }
  0xc8   : > { %v662_v36 = vmin.f32 %v646_v33, 20.0 }
  0xc9   : > { %v663_v37 = vmin.f32 %v647_v35, 20.0  ;;  %vm711_vm14 = vcmp.eq.s32.totalorder %v695_v32, 1 }
  0xca   : > { %v718_v40 = vsel %vm1421_vm4, %v662_v36, 0.0 }
  0xcb   : > { %v473_v38 = vpop.f32.mrf.mxu2  ;;  %v486_v42 = vpop.f32.mrf.mxu3  ;;  %v719_v45 = vsel %vm703_vm5, %v663_v37, 0.0 }
  0xcc   : > { %v474_v41 = vadd.f32 %v473_v38, %v1415_v26  ;;  %v449_v44 = vpop.f32.mrf.mxu0  ;;  %v487_v46 = vadd.f32 %v486_v42, %v1415_v26  ;;  %v462_v47 = vpop.f32.mrf.mxu1  ;;  %v734_v48 = vpack.c.bf16 %v719_v45, %v718_v40 }
  0xce   : > { %v648_v49 = vmax.f32 %v474_v41, 0.0  ;;  %v649_v50 = vmax.f32 %v487_v46, 0.0  ;;  %742 = vst [vmem:[%s1432_s13] sm:$0xff] %v734_v48 }
  0xd0   : > { %v664_v51 = vmin.f32 %v648_v49, 20.0  ;;  %v665_v52 = vmin.f32 %v649_v50, 20.0 }
  0xd2   : > { %v720_v53 = vsel %vm704_vm6, %v664_v51, 0.0  ;;  %v721_v54 = vsel %vm705_vm7, %v665_v52, 0.0 }
  0xd3   : > { %v475_v55 = vpop.f32.mrf.mxu2  ;;  %v735_v56 = vpack.c.bf16 %v721_v54, %v720_v53  ;;  %v488_v57 = vpop.f32.mrf.mxu3 }
  0xd4   : > { %v499_v58 = vpop.f32.mrf.mxu0  ;;  %v512_v61 = vpop.f32.mrf.mxu1 }
  0xd5   : > { %v500_v60 = vadd.f32 %v499_v58, %v1415_v26  ;;  %743 = vst [vmem:[%s1432_s13 + $0x8] sm:$0xff] %v735_v56  ;;  %v513_v63 = vadd.f32 %v512_v61, %v1415_v26  ;;  %v698_v58 = vperm.slane %v1449_v21, 4  ;;  %v699_v61 = vperm.slane %v1449_v21, 5 }
  0xd7   : > { %v650_v0 = vmax.f32 %v500_v60, 0.0  ;;  %v651_v1 = vmax.f32 %v513_v63, 0.0  ;;  %vm714_vm1 = vcmp.eq.s32.totalorder %v698_v58, 1  ;;  %vm715_vm2 = vcmp.eq.s32.totalorder %v699_v61, 1 }
  0xd9   : > { %v666_v2 = vmin.f32 %v650_v0, 20.0  ;;  %v667_v3 = vmin.f32 %v651_v1, 20.0 }
  0xdb   : > { %v722_v5 = vsel %vm706_vm8, %v666_v2, 0.0  ;;  %v525_v6 = vpop.f32.mrf.mxu2  ;;  %v723_v8 = vsel %vm707_vm9, %v667_v3, 0.0  ;;  %v538_v10 = vpop.f32.mrf.mxu3 }
  0xdc   : > { %v526_v9 = vadd.f32 %v525_v6, %v1415_v26  ;;  %v501_v12 = vpop.f32.mrf.mxu0  ;;  %v736_v13 = vpack.c.bf16 %v723_v8, %v722_v5  ;;  %v539_v14 = vadd.f32 %v538_v10, %v1415_v26  ;;  %v514_v15 = vpop.f32.mrf.mxu1  ;;  %v700_v5 = vperm.slane %v1449_v21, 6 }
  0xde   : > { %v652_v16 = vmax.f32 %v526_v9, 0.0  ;;  %744 = vst [vmem:[%s1432_s13 + $0x10] sm:$0xff] %v736_v13  ;;  %v653_v17 = vmax.f32 %v539_v14, 0.0  ;;  %v701_v9 = vperm.slane %v1449_v21, 7  ;;  %vm716_vm3 = vcmp.eq.s32.totalorder %v700_v5, 1 }
  0xe0   : > { %v668_v18 = vmin.f32 %v652_v16, 20.0  ;;  %v669_v22 = vmin.f32 %v653_v17, 20.0  ;;  %vm717_vm4 = vcmp.eq.s32.totalorder %v701_v9, 1 }
  0xe2   : > { %v724_v23 = vsel %vm708_vm11, %v668_v18, 0.0  ;;  %v725_v24 = vsel %vm709_vm12, %v669_v22, 0.0 }
  0xe3   : > { %v527_v25 = vpop.f32.mrf.mxu2  ;;  %v737_v27 = vpack.c.bf16 %v725_v24, %v724_v23  ;;  %v540_v28 = vpop.f32.mrf.mxu3 }
  0xe4   : > { %v551_v29 = vpop.f32.mrf.mxu0  ;;  %v564_v31 = vpop.f32.mrf.mxu1 }
  0xe5   : > { %v552_v19 = vadd.f32 %v551_v29, %v1415_v26  ;;  %745 = vst [vmem:[%s1432_s13 + $0x18] sm:$0xff] %v737_v27  ;;  %v565_v33 = vadd.f32 %v564_v31, %v1415_v26 }
  0xe7   : > { %v654_v34 = vmax.f32 %v552_v19, 0.0  ;;  %v655_v20 = vmax.f32 %v565_v33, 0.0 }
  0xe9   : > { %v670_v35 = vmin.f32 %v654_v34, 20.0  ;;  %v671_v36 = vmin.f32 %v655_v20, 20.0 }
  0xeb   : > { %v726_v37 = vsel %vm710_vm13, %v670_v35, 0.0  ;;  %v577_v38 = vpop.f32.mrf.mxu2  ;;  %v727_v40 = vsel %vm711_vm14, %v671_v36, 0.0  ;;  %v590_v42 = vpop.f32.mrf.mxu3 }
  0xec   : > { %v578_v41 = vadd.f32 %v577_v38, %v1415_v26  ;;  %v553_v44 = vpop.f32.mrf.mxu0  ;;  %v738_v45 = vpack.c.bf16 %v727_v40, %v726_v37  ;;  %v591_v46 = vadd.f32 %v590_v42, %v1415_v26  ;;  %v566_v47 = vpop.f32.mrf.mxu1 }
  0xee   : > { %v656_v48 = vmax.f32 %v578_v41, 0.0  ;;  %746 = vst [vmem:[%s1432_s13 + $0x20] sm:$0xff] %v738_v45  ;;  %v657_v49 = vmax.f32 %v591_v46, 0.0 }
  0xf0   : > { %v672_v50 = vmin.f32 %v656_v48, 20.0  ;;  %v673_v51 = vmin.f32 %v657_v49, 20.0 }
  0xf2   : > { %v728_v52 = vsel %vm712_vm15, %v672_v50, 0.0  ;;  %v729_v53 = vsel %vm713_vm0, %v673_v51, 0.0 }
  0xf3   : > { %v579_v54 = vpop.f32.mrf.mxu2  ;;  %v739_v55 = vpack.c.bf16 %v729_v53, %v728_v52  ;;  %v592_v56 = vpop.f32.mrf.mxu3 }
  0xf4   : > { %v603_v57 = vpop.f32.mrf.mxu0  ;;  %v616_v60 = vpop.f32.mrf.mxu1 }
  0xf5   : > { %v604_v59 = vadd.f32 %v603_v57, %v1415_v26  ;;  %747 = vst [vmem:[%s1432_s13 + $0x28] sm:$0xff] %v739_v55  ;;  %v617_v62 = vadd.f32 %v616_v60, %v1415_v26 }
  0xf7   : > { %v658_v63 = vmax.f32 %v604_v59, 0.0  ;;  %v659_v0 = vmax.f32 %v617_v62, 0.0 }
  0xf9   : > { %v674_v1 = vmin.f32 %v658_v63, 20.0  ;;  %v675_v2 = vmin.f32 %v659_v0, 20.0 }
  0xfb   : > { %v730_v3 = vsel %vm714_vm1, %v674_v1, 0.0  ;;  %v629_v4 = vpop.f32.mrf.mxu2  ;;  %v731_v6 = vsel %vm715_vm2, %v675_v2, 0.0  ;;  %v642_v8 = vpop.f32.mrf.mxu3 }
  0xfc   : > { %v630_v7 = vadd.f32 %v629_v4, %v1415_v26  ;;  %v605_v10 = vpop.f32.mrf.mxu0  ;;  %v740_v11 = vpack.c.bf16 %v731_v6, %v730_v3  ;;  %v643_v12 = vadd.f32 %v642_v8, %v1415_v26  ;;  %v618_v13 = vpop.f32.mrf.mxu1 }
  0xfe   : > { %v660_v14 = vmax.f32 %v630_v7, 0.0  ;;  %748 = vst [vmem:[%s1432_s13 + $0x30] sm:$0xff] %v740_v11  ;;  %v661_v15 = vmax.f32 %v643_v12, 0.0 }
 0x100   : > { %v676_v16 = vmin.f32 %v660_v14, 20.0  ;;  %v677_v17 = vmin.f32 %v661_v15, 20.0 }
 0x102   : > { %v732_v18 = vsel %vm716_vm3, %v676_v16, 0.0  ;;  %v733_v21 = vsel %vm717_vm4, %v677_v17, 0.0 }
 0x103   : > { %v631_v26 = vpop.f32.mrf.mxu2  ;;  %v741_v22 = vpack.c.bf16 %v733_v21, %v732_v18  ;;  %v644_v23 = vpop.f32.mrf.mxu3 }
 0x105   : > { %749 = vst [vmem:[%s1432_s13 + $0x38] sm:$0xff] %v741_v22 }
 0x106   : > { %1088 = shalt.err (!%p1085_p10)
}
 0x107   : > { %974 = dma.vmem_to_hbm [thread:$0]  (%p1255_p8), %s767_s20, 1024, %s769_s21, %s751_s29  }
 0x108 PF: > { %p980_p11 = scmp.ge.s32.totalorder %s1157_s28, 2  ;;  %s780_s12 = sand.u32 1, %s1129_s22  }
 0x109   : > { %s781_s13 = scalar_lea.sflag [#allocation6], %s780_s12 }
 0x10a   : > { %p977_p12 = pnand %p980_p11, %p1259_p9 }
 0x10c   : > { %p978_p13 = pneg %p977_p12 }
 0x10e   : > { %1124 = dma.done.wait (%p978_p13), %s781_s13, 1024  }
 0x10f   : > { %1126 = vsyncadd (%p978_p13), %s781_s13, 4294966272  ;;  %s26_s28 = sadd.s32 1, %s1157_s28   ;;  %s1528_s22 = smov %s1133_s23 }
 0x110   : > { %p23_p0 = scmp.ge.s32.totalorder %s26_s28, 6   ;;  %s1529_s23 = smov %s1137_s24 }
 0x111   : > { %s1530_s24 = smov %s1267_s15  ;;  %s1531_s25 = smov %s1149_s27 }
 0x112   : > { %s1532_s26 = smov %s1153_s0  ;;  %s1533_s27 = smov %s1536_s6 }
 0x113   : > { %s1534_s0 = smov %s1540_s7  ;;  %25 = sbr.rel (!%p23_p0) target bundleno = 11 (0xb), region = 102 }
 0x118   :  { %787 = vsyncpa [#allocation6], 1 }
 0x119   :  { %789 = vsyncpa [#allocation6 + $0x1], 1 }

</bundles_post_ra>
